<compile_context>
chip_gen: v5e
topology: v5e:2x2
jax: 0.10.0
libtpu: 0.0.40
codegen_flags: <defaults>
</compile_context>

<pallas_src>
import jax
import jax.numpy as jnp
import numpy as np
from jax.experimental import pallas as pl
from jax.experimental.pallas import tpu as pltpu


# --------------------------------------------------------------------------
# Hardware / tiling helpers
# --------------------------------------------------------------------------

def _vmem_capacity_bytes():
    """Physical VMEM per TensorCore; conservative (v7x) fallback."""
    try:
        info = pltpu.get_tpu_info()
        cap = getattr(info, "vmem_capacity_bytes", None)
        if cap:
            return int(cap)
    except Exception:
        pass
    return 64 << 20


def _sublane(dtype):
    """Minimum row alignment for this dtype (f32->8, bf16->16, int8->32)."""
    bits = jnp.dtype(dtype).itemsize * 8
    return max(8, 256 // bits)


def _budget_and_cap(vmem_cap):
    """(A-pipeline byte budget, scoped-VMEM cap) per TPU generation."""
    if vmem_cap >= (96 << 20):      # v5e / v6e: 128 MiB physical VMEM
        return 96 << 20, 104 << 20
    return 44 << 20, 56 << 20       # v7x: 64 MiB physical VMEM per TC


def _pick_tm(n, a_dtype, vmem_cap):
    """Row-tile height and scoped-VMEM cap.

    Budgets 3 A-tile-sized slabs: 2 pipeline buffers + 1 slab of headroom for
    any (tm, n) temporary Mosaic materializes for the `a * xt` product.
    """
    sub = _sublane(a_dtype)
    itemsize = jnp.dtype(a_dtype).itemsize
    budget, cap = _budget_and_cap(vmem_cap)
    tm = budget // max(1, 3 * n * itemsize)
    if n >= 2 * sub:
        # >= 2 grid steps: DMA pipeline overlap + v7x megacore sharding.
        tm = min(tm, int(pl.cdiv(n, 2)))
    tm = min(tm, n)
    tm = max(sub, (int(tm) // sub) * sub)
    return int(tm), cap


# --------------------------------------------------------------------------
# Single state vector path (module forward semantics: x is (n, 1))
# --------------------------------------------------------------------------

def _sis_kernel(a_ref, x_ref, xt_ref, o_ref):
    """One row block: f_i = -x_i + (1 - x_i) * sum_j A_ij * x_j."""
    a = a_ref[...].astype(jnp.float32)    # (TM, n) row block of A (bf16 upcast ok)
    x = x_ref[...].astype(jnp.float32)    # (TM, 1) x_i for this block's rows
    xt = xt_ref[...].astype(jnp.float32)  # (1,  n) full x as a row (x_j), constant
    # Row-block of A @ x: VPU multiply + XLU lane reduce (MXU stays idle; this
    # kernel is HBM-bandwidth bound on the streaming of A).
    ax = jnp.sum(a * xt, axis=1, keepdims=True)            # (TM, 1)
    o_ref[...] = (-x + (1.0 - x) * ax).astype(o_ref.dtype)


def sis_dynamics(A, x, tm=None):
    """Pallas TPU implementation of SisDynamics.forward(t, x), dense A.

    A: (n, n) adjacency matrix (float32 or bfloat16).
    x: (n, 1) float32 state vector.
    returns: (n, 1) dx/dt.  (t is unused: autonomous system.)
    """
    n = x.shape[0]
    assert A.shape == (n, n)
    assert x.shape == (n, 1)
    a_itemsize = jnp.dtype(A.dtype).itemsize
    x_itemsize = jnp.dtype(x.dtype).itemsize

    vmem_cap = _vmem_capacity_bytes()
    sub = _sublane(A.dtype)
    auto_tm, cap = _pick_tm(n, A.dtype, vmem_cap)
    if tm is None:
        tm = auto_tm
    tm = max(sub, (int(tm) // sub) * sub)

    # Row view of x for broadcasting inside the kernel (tiny, no n^2 copy).
    xt = jnp.reshape(x, (1, n))

    # Scoped VMEM: 2 pipeline buffers of the (tm, n) A block, one A-tile of
    # headroom for the `a * xt` temporary, plus the (tiny) x / xt / out buffers.
    vmem_need = 3 * tm * n * a_itemsize + 2 * x_itemsize * (tm + n + tm)
    vmem_limit = int(min(max(vmem_need + (4 << 20), 32 << 20), cap))

    grid = (int(pl.cdiv(n, tm)),)        # ragged last block is masked by Pallas
    cost = pl.CostEstimate(
        flops=2 * n * n + 3 * n,
        transcendentals=0,
        bytes_accessed=a_itemsize * n * n + x_itemsize * 3 * n,
    )

    return pl.pallas_call(
        _sis_kernel,
        out_shape=jax.ShapeDtypeStruct((n, 1), x.dtype),
        grid=grid,
        in_specs=[
            pl.BlockSpec((tm, n), lambda i: (i, 0)),   # A row block (streamed)
            pl.BlockSpec((tm, 1), lambda i: (i, 0)),   # x_i slice
            # Constant block index -> Pallas skips re-DMA of unchanged blocks,
            # so the full-x row is fetched once and stays resident.
            pl.BlockSpec((1, n), lambda i: (0, 0)),
        ],
        out_specs=pl.BlockSpec((tm, 1), lambda i: (i, 0)),
        compiler_params=pltpu.CompilerParams(
            dimension_semantics=("parallel",),         # megacore-shard rows (v7x)
            vmem_limit_bytes=vmem_limit,
        ),
        cost_estimate=cost,
    )(A, x, xt)


# --------------------------------------------------------------------------
# Batched path: many state vectors, small n (production n ~ 128).
# X is (n, B); each column is an independent state vector sharing A.
# --------------------------------------------------------------------------

def _sis_batched_kernel(a_ref, x_ref, o_ref):
    a = a_ref[...]                                           # (n, n), VMEM resident
    x = x_ref[...]                                           # (n, tb)
    ax = jnp.dot(a, x, preferred_element_type=jnp.float32)   # MXU matmul
    xf = x.astype(jnp.float32)
    o_ref[...] = (-xf + (1.0 - xf) * ax).astype(o_ref.dtype)


def sis_dynamics_batched(A, X, tb=None):
    """f[:, b] = -x_b + (1 - x_b) * (A @ x_b) for every column b of X."""
    n, B = X.shape
    assert A.shape == (n, n)
    a_itemsize = jnp.dtype(A.dtype).itemsize
    x_itemsize = jnp.dtype(X.dtype).itemsize
    _, cap = _budget_and_cap(_vmem_capacity_bytes())
    # A is held resident in VMEM via a constant index_map -> only for small n.
    assert 2 * n * n * a_itemsize <= cap // 2, "batched path expects A to fit in VMEM"

    if tb is None:
        tb = 128 if B >= 128 else B
    if tb % 128 != 0 and tb != B:        # keep the (8,128) rule satisfied
        tb = 128 if B >= 128 else B
    tb = int(tb)

    vmem_need = 2 * a_itemsize * n * n + 2 * x_itemsize * (2 * n * tb) + 4 * n * tb
    vmem_limit = int(min(max(vmem_need + (4 << 20), 32 << 20), cap))

    grid = (int(pl.cdiv(B, tb)),)
    cost = pl.CostEstimate(
        flops=2 * n * n * B + 3 * n * B,
        transcendentals=0,
        bytes_accessed=a_itemsize * n * n + x_itemsize * 2 * n * B,
    )

    return pl.pallas_call(
        _sis_batched_kernel,
        out_shape=jax.ShapeDtypeStruct((n, B), X.dtype),
        grid=grid,
        in_specs=[
            pl.BlockSpec((n, n), lambda j: (0, 0)),    # A resident (constant block)
            pl.BlockSpec((n, tb), lambda j: (0, j)),   # column block of X
        ],
        out_specs=pl.BlockSpec((n, tb), lambda j: (0, j)),   # lane-dense output
        compiler_params=pltpu.CompilerParams(
            dimension_semantics=("parallel",),
            vmem_limit_bytes=vmem_limit,
        ),
        cost_estimate=cost,
    )(A, X)


# --------------------------------------------------------------------------
# Pure-JAX references (mirror the torch dense branch exactly)
# --------------------------------------------------------------------------

def sis_dynamics_ref(A, x):
    f = -x
    outer = A @ (x - x @ x.T)
    return f + jnp.diag(outer).reshape(-1, 1)


if __name__ == "__main__":
    key = jax.random.PRNGKey(0)
    k_a, k_x, k_ab, k_xb = jax.random.split(key, 4)

    # ---- single state vector (module forward semantics) ----
    n = 256
    A = jax.random.uniform(k_a, (n, n), dtype=jnp.float32)
    A = (A + A.T) * 0.5
    A = A * (1.0 - jnp.eye(n, dtype=jnp.float32))
    x = jax.random.uniform(k_x, (n, 1), dtype=jnp.float32)

    out = jax.block_until_ready(sis_dynamics(A, x))   # auto tm -> 128, grid=(2,)
    ref = sis_dynamics_ref(A, x)
    np.testing.assert_allclose(np.asarray(out), np.asarray(ref),
                               rtol=1e-4, atol=1e-4)
    assert out.shape == (n, 1)

    # ---- batched state vectors (production n ~ 128) ----
    nb, B = 128, 256
    Ab = jax.random.uniform(k_ab, (nb, nb), dtype=jnp.float32)
    Ab = (Ab + Ab.T) * 0.5
    Ab = Ab * (1.0 - jnp.eye(nb, dtype=jnp.float32))
    Xb = jax.random.uniform(k_xb, (nb, B), dtype=jnp.float32)

    outb = jax.block_until_ready(sis_dynamics_batched(Ab, Xb))
    refb = jax.vmap(lambda col: sis_dynamics_ref(Ab, col[:, None])[:, 0],
                    in_axes=1, out_axes=1)(Xb)
    np.testing.assert_allclose(np.asarray(outb), np.asarray(refb),
                               rtol=1e-4, atol=1e-4)
    assert outb.shape == (nb, B)

    print("KERNEL_OK")
</pallas_src>

<mosaic_0001>
module attributes {stable_mosaic.version = 11 : i64} {
  func.func @_sis_kernel(%arg0: i32, %arg1: memref<128x256xf32, #tpu.memory_space<vmem>>, %arg2: memref<128x1xf32, #tpu.memory_space<vmem>>, %arg3: memref<1x256xf32, #tpu.memory_space<vmem>>, %arg4: memref<128x1xf32, #tpu.memory_space<vmem>>) attributes {dimension_semantics = [#tpu.dimension_semantics<parallel>], iteration_bounds = array<i64: 2>, scalar_prefetch = 0 : i64, scratch_operands = 0 : i64, tpu.core_type = #tpu.core_type<tc>, window_params = [{transform_indices = @transform_0, window_bounds = array<i64: 128, 256>}, {transform_indices = @transform_1, window_bounds = array<i64: 128, 1>}, {pipeline_mode = #tpu.pipeline_mode<synchronous>, transform_indices = @transform_2, window_bounds = array<i64: 1, 256>}, {transform_indices = @transform_3, window_bounds = array<i64: 128, 1>}]} {
    %c0 = arith.constant 0 : index
    %c0_0 = arith.constant 0 : index
    %0 = vector.load %arg1[%c0, %c0_0] : memref<128x256xf32, #tpu.memory_space<vmem>>, vector<128x256xf32>
    %c0_1 = arith.constant 0 : index
    %c0_2 = arith.constant 0 : index
    %1 = vector.load %arg2[%c0_1, %c0_2] : memref<128x1xf32, #tpu.memory_space<vmem>>, vector<128x1xf32>
    %c0_3 = arith.constant 0 : index
    %c0_4 = arith.constant 0 : index
    %2 = vector.load %arg3[%c0_3, %c0_4] : memref<1x256xf32, #tpu.memory_space<vmem>>, vector<1x256xf32>
    %3 = vector.broadcast %2 : vector<1x256xf32> to vector<128x256xf32>
    %4 = arith.mulf %0, %3 : vector<128x256xf32>
    %cst = arith.constant dense<0.000000e+00> : vector<128xf32>
    %5 = vector.multi_reduction <add>, %4, %cst [1] : vector<128x256xf32> to vector<128xf32>
    %6 = vector.shape_cast %5 : vector<128xf32> to vector<128x1xf32>
    %cst_5 = arith.constant 0.000000e+00 : f32
    %7 = vector.broadcast %cst_5 : f32 to vector<128x1xf32>
    %8 = arith.subf %7, %1 : vector<128x1xf32>
    %cst_6 = arith.constant 1.000000e+00 : f32
    %9 = vector.broadcast %cst_6 : f32 to vector<128x1xf32>
    %10 = arith.subf %9, %1 : vector<128x1xf32>
    %11 = arith.mulf %10, %6 : vector<128x1xf32>
    %12 = arith.addf %8, %11 : vector<128x1xf32>
    %c0_7 = arith.constant 0 : index
    %c0_8 = arith.constant 0 : index
    %13 = vector.load %arg4[%c0_7, %c0_8] : memref<128x1xf32, #tpu.memory_space<vmem>>, vector<128x1xf32>
    tpu.vector_store %arg4[%c0_7, %c0_8], %12 {strides = array<i32>} : memref<128x1xf32, #tpu.memory_space<vmem>>, vector<128x1xf32>,
    return
  }
  func.func @transform_0(%arg0: i32) -> (i32, i32) {
    %c0_i32 = arith.constant 0 : i32
    %c0_i32_0 = arith.constant 0 : i32
    return %arg0, %c0_i32 : i32, i32
  }
  func.func @transform_1(%arg0: i32) -> (i32, i32) {
    %c0_i32 = arith.constant 0 : i32
    %c0_i32_0 = arith.constant 0 : i32
    return %arg0, %c0_i32 : i32, i32
  }
  func.func @transform_2(%arg0: i32) -> (i32, i32) {
    %c0_i32 = arith.constant 0 : i32
    %c0_i32_0 = arith.constant 0 : i32
    %c0_i32_1 = arith.constant 0 : i32
    return %c0_i32, %c0_i32_0 : i32, i32
  }
  func.func @transform_3(%arg0: i32) -> (i32, i32) {
    %c0_i32 = arith.constant 0 : i32
    %c0_i32_0 = arith.constant 0 : i32
    return %arg0, %c0_i32 : i32, i32
  }
}

</mosaic_0001>

<bundles_post_ra>
// kernel: tpu_custom_call.1
= control target key start
LH: loop header
LB: loop body
LE: loop exit
PB: predicated region body
PF: predicated region fallthrough
CT: control target
= control target key end

     0   :  { %8 = vsyncpa [#allocation3], 0  ;;  %s878_s0 = inlined_call_operand.hbm [shape: f32[256,256], index: 0, kind: input, shape index: {}]   ;;  %s879_s1 = inlined_call_operand.vmem [shape: f32[256,1], index: 1, kind: input, shape index: {}]   ;;  %s880_s2 = inlined_call_operand.vmem [shape: f32[1,256], index: 2, kind: input, shape index: {}]   ;;  %s881_s3 = inlined_call_operand.vmem [shape: f32[256,1], index: 3, kind: output, shape index: {}]  }
   0x1   :  { %10 = vsyncpa [#allocation3 + $0x1], 0  ;;  %s659_s12 = smov 0   ;;  %s661_s13 = smov 0  }
   0x2   :  { %s663_s14 = smov 0   ;;  %s665_s15 = smov 0  }
   0x3 LB: > { %s512_s16 = sadd.s32 4294967295, %s635_s15   ;;  %s679_s17 = sadd.s32 1, %s635_s15   ;;  %s635_s15 = sphi %s665_s15, %s888_s15   ;;  %s631_s14 = sphi %s663_s14, %s887_s14   ;;  %s627_s13 = sphi %s661_s13, %s886_s13   ;;  %s623_s12 = sphi %s659_s12, %s885_s12  }
   0x4   : > { %s20_s18 = ssub.s32 %s635_s15, %s679_s17  ;;  %s23_s19 = sadd.s32 1, %s631_s14 }
   0x5   : > { %p21_p0 = scmp.eq.s32.totalorder %s20_s18, 0  ;;  %p30_p1 = scmp.ne.s32.totalorder %s631_s14, %s627_s13 }
   0x6   : > { %p31_p2 = scmp.eq.s32.totalorder %s635_s15, 0  ;;  %p36_p3 = scmp.ne.s32.totalorder %s627_s13, %s623_s12 }
   0x7   : > { %s689_s20 = scalar_select %p21_p0, %s631_s14, %s23_s19  }
   0x8   : > { %p691_p4 = por %p31_p2, %p30_p1  ;;  %p37_p5 = scmp.eq.s32.totalorder %s512_s16, 0 }
   0x9   : > { %p536_p6 = scmp.lt.s32.totalorder %s635_s15, 2  ;;  %s136_s23 = sand.u32 1, %s631_s14  }
   0xa   : > { %p698_p7 = por %p37_p5, %p36_p3  ;;  %s516_s24 = sshll.u32 %s136_s23, 8 }
   0xb   : > { %s529_s25 = sshll.u32 %s635_s15, 8  ;;  %s140_s29 = scalar_lea.vmem [#allocation2], %s516_s24 }
   0xc   : > { %s146_s28 = scalar_lea.hbm %s878_s0, %s529_s25  ;;  %s149_s30 = sshll.u32 %s140_s29, 4  ;;  %s150_s30 = int_to_ptr.vmem [resolvable:$true] %s149_s30 }
   0xd   : > { %s147_s4 = sshll.u32 %s146_s28, 4  ;;  %p709_p8 = pnand %p536_p6, %p691_p4  ;;  %s148_s4 = int_to_ptr.hbm [resolvable:$true] %s147_s4 }
   0xe   : > { %p520_p9 = scmp.ge.s32.totalorder %s635_s15, 1  ;;  %s137_s6 = scalar_lea.sflag [#allocation3], %s136_s23 }
   0xf   : > { %s571_s7 = sshra.s32 %s148_s4, 4  ;;  %p575_p11 = pneg %p709_p8  ;;  %s572_s7 = int_to_ptr.hbm [resolvable:$true] %s571_s7 }
  0x10   : > { %s573_s8 = scalar_lea.hbm %s572_s7, 256  ;;  %s578_s11 = scalar_lea.hbm %s878_s0, 512 }
  0x11   : > { %p574_p10 = scmp.ne.s32.totalorder %s572_s7, %s573_s8  ;;  %p579_p0 = scmp.lt.s32.totalorder %s572_s7, %s878_s0 }
  0x12   : > { %p580_p1 = scmp.lt.s32.totalorder %s578_s11, %s573_s8 }
  0x13   : > { %p576_p12 = pnand %p575_p11, %p574_p10 }
  0x14   : > { %p581_p2 = por %p580_p1, %p579_p0 }
  0x15   : > { %p577_p13 = pneg %p576_p12 }
  0x17   : > { %p582_p3 = pnand %p581_p2, %p577_p13 }
  0x19   : > { %585 = shalt.err (!%p582_p3)
}
  0x1a   : > { %s637_s19 = smov 256   ;;  %s638_s21 = smov 16  }
  0x1b   : > { %535 = dma.hbm_to_vmem [thread:$0]  (!%p709_p8), %s148_s4, 4096, %s150_s30, %s137_s6, %s637_s19, %s637_s19, %s638_s21  }
  0x1c   : > { %p166_p4 = scmp.lt.s32.totalorder %s635_s15, 3 }
  0x1e   : > { %p167_p5 = pnand %p520_p9, %p166_p4 }
  0x1f   : > { %s172_s23 = sand.u32 (!%p167_p5), 1, %s627_s13  }
  0x20   : > { %170 = sbr.rel (%p167_p5) target bundleno = 207 (0xcf), region = 32  ;;  %s521_s24 = sshll.u32 (!%p167_p5), %s172_s23, 8 }
  0x21   : > { %s173_s25 = scalar_lea.sflag (!%p167_p5), [#allocation3], %s172_s23  ;;  %s728_s26 = scalar_lea.vmem (!%p167_p5), [#allocation2], %s521_s24 }
  0x25   : > { %618 = dma.done.wait (%p698_p7), %s173_s25, 4096  }
  0x26   : > { %620 = vsyncadd (%p698_p7), %s173_s25, 4294963200  ;;  %v218_v0 = vld [vmem:[%s728_s26] sm:$0xff]  ;;  %v219_v1 = vld [vmem:[%s728_s26 + $0x8] sm:$0xff]  ;;  %s522_s22 = sshll.u32 %s512_s16, 4  ;;  %vm416_vm0 = vcmask 7168  }
  0x27   : > { %v266_v2 = vld [vmem:[%s880_s2] sm:$0x3]  ;;  %v227_v6 = vld [vmem:[%s728_s26 + $0x48] sm:$0xff]  ;;  %v220_v13 = vld [vmem:[%s728_s26 + $0x10] sm:$0xff]  ;;  %p207_p6 = scmp.lt.s32.totalorder %s522_s22, 31 }
  0x28   : > { %v739_v3 = vperm.slane %v266_v2, 0  ;;  %v741_v4 = vperm.slane %v266_v2, 1  ;;  %v226_v5 = vld [vmem:[%s728_s26 + $0x40] sm:$0xff]  ;;  %v223_v8 = vld [vmem:[%s728_s26 + $0x28] sm:$0xff]  ;;  %v221_v16 = vld [vmem:[%s728_s26 + $0x18] sm:$0xff] }
  0x29   : > { %v222_v7 = vld [vmem:[%s728_s26 + $0x20] sm:$0xff]  ;;  %v228_v17 = vld [vmem:[%s728_s26 + $0x50] sm:$0xff]  ;;  %v229_v18 = vld [vmem:[%s728_s26 + $0x58] sm:$0xff]  ;;  %s890_s22 = smov (!%p207_p6, %s522_s22), 31 }
  0x2a   : > { %v272_v9 = vmul.f32 %v739_v3, %v218_v0  ;;  %v273_v10 = vmul.f32 %v741_v4, %v219_v1  ;;  %v280_v11 = vmul.f32 %v739_v3, %v226_v5  ;;  %v281_v12 = vmul.f32 %v741_v4, %v227_v6  ;;  %v224_v21 = vld [vmem:[%s728_s26 + $0x30] sm:$0xff]  ;;  %v225_v22 = vld [vmem:[%s728_s26 + $0x38] sm:$0xff]  ;;  %v230_v32 = vld [vmem:[%s728_s26 + $0x60] sm:$0xff]  ;;  %s523_s29 = sshll.u32 %s890_s22, 3 }
  0x2b   : > { %v276_v14 = vmul.f32 %v739_v3, %v222_v7  ;;  %v277_v15 = vmul.f32 %v741_v4, %v223_v8  ;;  %v274_v24 = vmul.f32 %v739_v3, %v220_v13  ;;  %v275_v25 = vmul.f32 %v741_v4, %v221_v16  ;;  %v231_v34 = vld [vmem:[%s728_s26 + $0x68] sm:$0xff]  ;;  %v234_v35 = vld [vmem:[%s728_s26 + $0x80] sm:$0xff]  ;;  %v232_v37 = vld [vmem:[%s728_s26 + $0x70] sm:$0xff]  ;;  %s810_s5 = scalar_lea.vmem %s879_s1, %s523_s29  ;;  %s818_s6 = scalar_lea.vmem %s881_s3, %s523_s29 }
  0x2c   : > { %v304_v19 = vadd.f32 %v273_v10, %v272_v9  ;;  %v316_v20 = vadd.f32 %v281_v12, %v280_v11  ;;  %v282_v26 = vmul.f32 %v739_v3, %v228_v17  ;;  %v283_v27 = vmul.f32 %v741_v4, %v229_v18  ;;  %v235_v36 = vld [vmem:[%s728_s26 + $0x88] sm:$0xff]  ;;  %v233_v38 = vld [vmem:[%s728_s26 + $0x78] sm:$0xff]  ;;  %v236_v47 = vld [vmem:[%s728_s26 + $0x90] sm:$0xff] }
  0x2d   : > { %v310_v23 = vadd.f32 %v277_v15, %v276_v14  ;;  %v278_v28 = vmul.f32 %v739_v3, %v224_v21  ;;  %v279_v29 = vmul.f32 %v741_v4, %v225_v22  ;;  %v307_v30 = vadd.f32 %v275_v25, %v274_v24  ;;  %v237_v49 = vld [vmem:[%s728_s26 + $0x98] sm:$0xff]  ;;  %v240_v50 = vld [vmem:[%s728_s26 + $0xb0] sm:$0xff]  ;;  %v238_v52 = vld [vmem:[%s728_s26 + $0xa0] sm:$0xff] }
  0x2e   : > { %305 = vadd.xlane.f32.xlu0 %v304_v19  ;;  %317 = vadd.xlane.f32.xlu2 %v316_v20  ;;  %v319_v31 = vadd.f32 %v283_v27, %v282_v26  ;;  %v284_v39 = vmul.f32 %v739_v3, %v230_v32  ;;  %v285_v40 = vmul.f32 %v741_v4, %v231_v34  ;;  %v241_v51 = vld [vmem:[%s728_s26 + $0xb8] sm:$0xff]  ;;  %v239_v53 = vld [vmem:[%s728_s26 + $0xa8] sm:$0xff]  ;;  %v242_v62 = vld [vmem:[%s728_s26 + $0xc0] sm:$0xff] }
  0x2f   : > { %311 = vadd.xlane.f32.xlu1 %v310_v23  ;;  %v313_v33 = vadd.f32 %v279_v29, %v278_v28  ;;  %v288_v41 = vmul.f32 %v739_v3, %v234_v35  ;;  %v289_v42 = vmul.f32 %v741_v4, %v235_v36  ;;  %v286_v43 = vmul.f32 %v739_v3, %v232_v37  ;;  %v243_v0 = vld [vmem:[%s728_s26 + $0xc8] sm:$0xff]  ;;  %v246_v1 = vld [vmem:[%s728_s26 + $0xe0] sm:$0xff]  ;;  %v244_v5 = vld [vmem:[%s728_s26 + $0xd0] sm:$0xff] }
  0x30   : > { %v287_v44 = vmul.f32 %v741_v4, %v233_v38  ;;  %v322_v45 = vadd.f32 %v285_v40, %v284_v39  ;;  %v290_v54 = vmul.f32 %v739_v3, %v236_v47  ;;  %v291_v55 = vmul.f32 %v741_v4, %v237_v49  ;;  %v247_v2 = vld [vmem:[%s728_s26 + $0xe8] sm:$0xff]  ;;  %v245_v6 = vld [vmem:[%s728_s26 + $0xd8] sm:$0xff]  ;;  %v248_v16 = vld [vmem:[%s728_s26 + $0xf0] sm:$0xff] }
  0x31   : > { %v328_v46 = vadd.f32 %v289_v42, %v288_v41  ;;  %v294_v56 = vmul.f32 %v739_v3, %v240_v50  ;;  %v295_v57 = vmul.f32 %v741_v4, %v241_v51  ;;  %v292_v58 = vmul.f32 %v739_v3, %v238_v52  ;;  %v249_v17 = vld [vmem:[%s728_s26 + $0xf8] sm:$0xff]  ;;  %v250_v21 = vld [vmem:[%s810_s5] sm:$0xff]  ;;  %v251_v34 = vld [vmem:[%s810_s5 + $0x8] sm:$0xff] }
  0x32   : > { %v325_v48 = vadd.f32 %v287_v44, %v286_v43  ;;  %v293_v59 = vmul.f32 %v741_v4, %v239_v53  ;;  %v331_v60 = vadd.f32 %v291_v55, %v290_v54  ;;  %v296_v7 = vmul.f32 %v739_v3, %v242_v62  ;;  %v255_v35 = vld [vmem:[%s810_s5 + $0x28] sm:$0xff]  ;;  %v253_v38 = vld [vmem:[%s810_s5 + $0x18] sm:$0xff]  ;;  %v256_v52 = vld [vmem:[%s810_s5 + $0x30] sm:$0xff] }
  0x33   : > { %v337_v61 = vadd.f32 %v295_v57, %v294_v56  ;;  %v297_v8 = vmul.f32 %v741_v4, %v243_v0  ;;  %v300_v9 = vmul.f32 %v739_v3, %v246_v1  ;;  %v301_v10 = vmul.f32 %v741_v4, %v247_v2  ;;  %v258_v53 = vld [vmem:[%s810_s5 + $0x40] sm:$0xff]  ;;  %v257_v56 = vld [vmem:[%s810_s5 + $0x38] sm:$0xff] }
  0x34   : > { %v334_v63 = vadd.f32 %v293_v59, %v292_v58  ;;  %v298_v11 = vmul.f32 %v739_v3, %v244_v5  ;;  %v299_v12 = vmul.f32 %v741_v4, %v245_v6  ;;  %v302_v18 = vmul.f32 %v739_v3, %v248_v16  ;;  %v254_v3 = vld [vmem:[%s810_s5 + $0x20] sm:$0xff] }
  0x35   : > { %v340_v13 = vadd.f32 %v297_v8, %v296_v7  ;;  %v346_v14 = vadd.f32 %v301_v10, %v300_v9  ;;  %v303_v19 = vmul.f32 %v741_v4, %v249_v17  ;;  %v252_v4 = vld [vmem:[%s810_s5 + $0x10] sm:$0xff]  ;;  %v368_v22 = vsub.f32 1.0, %v250_v21  ;;  %v259_v8 = vld [vmem:[%s810_s5 + $0x48] sm:$0xff]  ;;  %v261_v9 = vld [vmem:[%s810_s5 + $0x58] sm:$0xff] }
  0x36   : > { %308 = vadd.xlane.f32.xlu0 %v307_v30  ;;  %320 = vadd.xlane.f32.xlu2 %v319_v31  ;;  %v343_v15 = vadd.f32 %v299_v12, %v298_v11  ;;  %v372_v23 = vsub.f32 1.0, %v254_v3  ;;  %v370_v24 = vsub.f32 1.0, %v252_v4  ;;  %v352_v25 = vsub.f32 0.0, %v250_v21  ;;  %v260_v12 = vld [vmem:[%s810_s5 + $0x50] sm:$0xff] }
  0x37   : > { %314 = vadd.xlane.f32.xlu1 %v313_v33  ;;  %v349_v20 = vadd.f32 %v303_v19, %v302_v18  ;;  %v356_v26 = vsub.f32 0.0, %v254_v3  ;;  %v354_v29 = vsub.f32 0.0, %v252_v4  ;;  %v369_v40 = vsub.f32 1.0, %v251_v34 }
  0x38   : > { %v373_v41 = vsub.f32 1.0, %v255_v35  ;;  %v371_v42 = vsub.f32 1.0, %v253_v38  ;;  %v353_v43 = vsub.f32 0.0, %v251_v34  ;;  %v357_v44 = vsub.f32 0.0, %v255_v35 }
  0x39   : > { %v355_v47 = vsub.f32 0.0, %v253_v38  ;;  %v374_v58 = vsub.f32 1.0, %v256_v52  ;;  %v376_v59 = vsub.f32 1.0, %v258_v53  ;;  %v360_v62 = vsub.f32 0.0, %v258_v53 }
  0x3a   : > { %v359_v1 = vsub.f32 0.0, %v257_v56  ;;  %v378_v16 = vsub.f32 1.0, %v260_v12  ;;  %v361_v17 = vsub.f32 0.0, %v259_v8  ;;  %v363_v18 = vsub.f32 0.0, %v261_v9 }
  0x3b   : > { %v362_v21 = vsub.f32 0.0, %v260_v12 }
  0x3e   : > { %323 = vadd.xlane.f32.xlu0 %v322_v45  ;;  %329 = vadd.xlane.f32.xlu2 %v328_v46 }
  0x3f   : > { %326 = vadd.xlane.f32.xlu1 %v325_v48 }
  0x46   : > { %332 = vadd.xlane.f32.xlu0 %v331_v60  ;;  %338 = vadd.xlane.f32.xlu2 %v337_v61  ;;  %v375_v60 = vsub.f32 1.0, %v257_v56  ;;  %v358_v61 = vsub.f32 0.0, %v256_v52 }
  0x47   : > { %335 = vadd.xlane.f32.xlu1 %v334_v63 }
  0x4e   : > { %341 = vadd.xlane.f32.xlu0 %v340_v13  ;;  %347 = vadd.xlane.f32.xlu2 %v346_v14  ;;  %v377_v14 = vsub.f32 1.0, %v259_v8 }
  0x4f   : > { %344 = vadd.xlane.f32.xlu1 %v343_v15  ;;  %v379_v15 = vsub.f32 1.0, %v261_v9 }
  0x56   : > { %350 = vadd.xlane.f32.xlu0 %v349_v20 }
  0xa1   : > { %v306_v27 = vpop.xlane.xlu0 %305  ;;  %v318_v28 = vpop.xlane.xlu2 %317 }
  0xa2   : > { %v384_v30 = vmul.f32 %v368_v22, %v306_v27  ;;  %v388_v31 = vmul.f32 %v372_v23, %v318_v28  ;;  %v312_v32 = vpop.xlane.xlu1 %311  ;;  %v263_v28 = vld [vmem:[%s810_s5 + $0x68] sm:$0xff] }
  0xa3   : > { %v386_v33 = vmul.f32 %v370_v24, %v312_v32  ;;  %v262_v24 = vld [vmem:[%s810_s5 + $0x60] sm:$0xff]  ;;  %v381_v32 = vsub.f32 1.0, %v263_v28 }
  0xa4   : > { %v400_v36 = vadd.f32 %v384_v30, %v352_v25  ;;  %v404_v37 = vadd.f32 %v388_v31, %v356_v26  ;;  %v264_v25 = vld [vmem:[%s810_s5 + $0x70] sm:$0xff]  ;;  %v380_v30 = vsub.f32 1.0, %v262_v24 }
  0xa5   : > { %v402_v39 = vadd.f32 %v386_v33, %v354_v29  ;;  %v382_v31 = vsub.f32 1.0, %v264_v25  ;;  %v364_v33 = vsub.f32 0.0, %v262_v24  ;;  %v366_v34 = vsub.f32 0.0, %v264_v25 }
  0xa6   : > { %417 = vst.msk [vmem:[%s818_s6] sm:$0xff] %vm416_vm0, %v400_v36 }
  0xa7   : > { %421 = vst.msk [vmem:[%s818_s6 + $0x20] sm:$0xff] %vm416_vm0, %v404_v37  ;;  %v365_v37 = vsub.f32 0.0, %v263_v28 }
  0xa8   : > { %419 = vst.msk [vmem:[%s818_s6 + $0x10] sm:$0xff] %vm416_vm0, %v402_v39 }
  0xa9   : > { %v309_v45 = vpop.xlane.xlu0 %308  ;;  %v321_v46 = vpop.xlane.xlu2 %320 }
  0xaa   : > { %v385_v48 = vmul.f32 %v369_v40, %v309_v45  ;;  %v389_v49 = vmul.f32 %v373_v41, %v321_v46  ;;  %v315_v50 = vpop.xlane.xlu1 %314 }
  0xab   : > { %v387_v51 = vmul.f32 %v371_v42, %v315_v50  ;;  %v265_v42 = vld [vmem:[%s810_s5 + $0x78] sm:$0xff] }
  0xac   : > { %v401_v54 = vadd.f32 %v385_v48, %v353_v43  ;;  %v405_v55 = vadd.f32 %v389_v49, %v357_v44  ;;  %v383_v46 = vsub.f32 1.0, %v265_v42 }
  0xad   : > { %v403_v57 = vadd.f32 %v387_v51, %v355_v47  ;;  %v367_v47 = vsub.f32 0.0, %v265_v42 }
  0xae   : > { %418 = vst.msk [vmem:[%s818_s6 + $0x8] sm:$0xff] %vm416_vm0, %v401_v54 }
  0xaf   : > { %422 = vst.msk [vmem:[%s818_s6 + $0x28] sm:$0xff] %vm416_vm0, %v405_v55 }
  0xb0   : > { %420 = vst.msk [vmem:[%s818_s6 + $0x18] sm:$0xff] %vm416_vm0, %v403_v57 }
  0xb1   : > { %v324_v63 = vpop.xlane.xlu0 %323  ;;  %v330_v0 = vpop.xlane.xlu2 %329 }
  0xb2   : > { %v390_v2 = vmul.f32 %v374_v58, %v324_v63  ;;  %v392_v5 = vmul.f32 %v376_v59, %v330_v0  ;;  %v327_v6 = vpop.xlane.xlu1 %326 }
  0xb3   : > { %v391_v7 = vmul.f32 %v375_v60, %v327_v6 }
  0xb4   : > { %v406_v10 = vadd.f32 %v390_v2, %v358_v61  ;;  %v408_v11 = vadd.f32 %v392_v5, %v360_v62 }
  0xb5   : > { %v407_v13 = vadd.f32 %v391_v7, %v359_v1 }
  0xb6   : > { %423 = vst.msk [vmem:[%s818_s6 + $0x30] sm:$0xff] %vm416_vm0, %v406_v10 }
  0xb7   : > { %425 = vst.msk [vmem:[%s818_s6 + $0x40] sm:$0xff] %vm416_vm0, %v408_v11 }
  0xb8   : > { %424 = vst.msk [vmem:[%s818_s6 + $0x38] sm:$0xff] %vm416_vm0, %v407_v13 }
  0xb9   : > { %v333_v19 = vpop.xlane.xlu0 %332  ;;  %v339_v20 = vpop.xlane.xlu2 %338 }
  0xba   : > { %v393_v3 = vmul.f32 %v377_v14, %v333_v19  ;;  %v395_v4 = vmul.f32 %v379_v15, %v339_v20  ;;  %v336_v22 = vpop.xlane.xlu1 %335 }
  0xbb   : > { %v394_v23 = vmul.f32 %v378_v16, %v336_v22 }
  0xbc   : > { %v409_v26 = vadd.f32 %v393_v3, %v361_v17  ;;  %v411_v27 = vadd.f32 %v395_v4, %v363_v18 }
  0xbd   : > { %v410_v29 = vadd.f32 %v394_v23, %v362_v21 }
  0xbe   : > { %426 = vst.msk [vmem:[%s818_s6 + $0x48] sm:$0xff] %vm416_vm0, %v409_v26 }
  0xbf   : > { %428 = vst.msk [vmem:[%s818_s6 + $0x58] sm:$0xff] %vm416_vm0, %v411_v27 }
  0xc0   : > { %427 = vst.msk [vmem:[%s818_s6 + $0x50] sm:$0xff] %vm416_vm0, %v410_v29 }
  0xc1   : > { %v342_v35 = vpop.xlane.xlu0 %341  ;;  %v348_v36 = vpop.xlane.xlu2 %347 }
  0xc2   : > { %v396_v38 = vmul.f32 %v380_v30, %v342_v35  ;;  %v398_v39 = vmul.f32 %v382_v31, %v348_v36  ;;  %v345_v40 = vpop.xlane.xlu1 %344 }
  0xc3   : > { %v397_v41 = vmul.f32 %v381_v32, %v345_v40 }
  0xc4   : > { %v412_v43 = vadd.f32 %v396_v38, %v364_v33  ;;  %v414_v44 = vadd.f32 %v398_v39, %v366_v34 }
  0xc5   : > { %v413_v45 = vadd.f32 %v397_v41, %v365_v37 }
  0xc6   : > { %429 = vst.msk [vmem:[%s818_s6 + $0x60] sm:$0xff] %vm416_vm0, %v412_v43 }
  0xc7   : > { %431 = vst.msk [vmem:[%s818_s6 + $0x70] sm:$0xff] %vm416_vm0, %v414_v44 }
  0xc8   : > { %430 = vst.msk [vmem:[%s818_s6 + $0x68] sm:$0xff] %vm416_vm0, %v413_v45 }
  0xc9   : > { %v351_v48 = vpop.xlane.xlu0 %350 }
  0xca   : > { %v399_v49 = vmul.f32 %v383_v46, %v351_v48 }
  0xcc   : > { %v415_v50 = vadd.f32 %v399_v49, %v367_v47 }
  0xce   : > { %432 = vst.msk [vmem:[%s818_s6 + $0x78] sm:$0xff] %vm416_vm0, %v415_v50 }
  0xcf PF: > { %p13_p7 = scmp.ge.s32.totalorder %s679_s17, 4   ;;  %s885_s12 = smov %s627_s13 }
  0xd0   : > { %s886_s13 = smov %s631_s14  ;;  %s887_s14 = smov %s689_s20 }
  0xd1   : > { %s888_s15 = smov %s679_s17  ;;  %15 = sbr.rel (!%p13_p7) target bundleno = 3 (0x3), region = 75 }
  0xd6   :  { %455 = vsyncpa [#allocation3], 1 }
  0xd7   :  { %457 = vsyncpa [#allocation3 + $0x1], 1 }

</bundles_post_ra>
